<compile_context>
chip_gen: v7x
topology: tpu7x:2x2x1
jax: 0.10.0
libtpu: 0.0.40
codegen_flags: <defaults>
</compile_context>

<pallas_src>
import jax
import jax.numpy as jnp
from jax import lax
from jax.experimental import pallas as pl
from jax.experimental.pallas import tpu as pltpu


def _make_patch_embed_kernel(bb, embed_on_lanes):
    """Kernel body. bb images per grid step (static, small).

    embed_on_lanes=True  -> o block (bb, tm, E): embed dim on lanes (E >= 128).
    embed_on_lanes=False -> o block (bb, E, tm): tokens on lanes (E < 128),
                            keeping stores lane-dense; wrapper transposes back.
    """

    def kernel(x_ref, w_ref, b_ref, o_ref):
        w = w_ref[...]                          # (C, E) resident in VMEM
        b = b_ref[...].astype(jnp.float32)      # (1, E) or (E, 1), f32
        for i in range(bb):                     # static unroll, bb <= 8
            x_i = x_ref[i]                      # (C, tm) -- tokens on lanes
            if embed_on_lanes:
                # (tm, E) = x_i^T @ w : channel->token transpose folded into
                # the MXU contraction (contract dim 0 of both operands).
                y = lax.dot_general(
                    x_i, w,
                    dimension_numbers=(((0,), (0,)), ((), ())),
                    preferred_element_type=jnp.float32)
            else:
                # (E, tm) = w^T @ x_i : lane-dense store for small E.
                y = lax.dot_general(
                    w, x_i,
                    dimension_numbers=(((0,), (0,)), ((), ())),
                    preferred_element_type=jnp.float32)
            o_ref[i] = (y + b).astype(o_ref.dtype)

    return kernel


def patch_embedding(x_nchw, weight, bias, *, tm=2048, tokens_per_step=2048,
                    compute_dtype=jnp.bfloat16, out_dtype=None,
                    input_buffers=2):
    """PatchEmbedding.forward: x.flatten(2).transpose(1, 2) @ W^T + b.

    x_nchw:  (B, C, H, W)
    weight:  (E, C)   (PyTorch nn.Linear layout)
    bias:    (E,)
    returns  (B, H*W, E) in `out_dtype` (default: x dtype)
    """
    B, C, H, W = x_nchw.shape
    E = weight.shape[0]
    HW = H * W
    if out_dtype is None:
        out_dtype = x_nchw.dtype

    # Free, contiguous reshape -- no host-side transpose / extra HBM pass.
    x_bct = x_nchw.reshape(B, C, HW)
    w_ce = weight.T                                  # (C, E)
    if compute_dtype is not None:
        if x_bct.dtype != compute_dtype:
            x_bct = x_bct.astype(compute_dtype)
        if w_ce.dtype != compute_dtype:
            w_ce = w_ce.astype(compute_dtype)

    embed_on_lanes = E >= 128
    b_arr = bias.reshape(1, E) if embed_on_lanes else bias.reshape(E, 1)

    in_bytes = jnp.dtype(x_bct.dtype).itemsize
    out_bytes = jnp.dtype(out_dtype).itemsize
    bias_bytes = jnp.dtype(b_arr.dtype).itemsize

    # ---- generation-aware VMEM budget -------------------------------------
    try:
        vmem_cap = int(pltpu.get_tpu_info().vmem_capacity_bytes)
    except Exception:
        vmem_cap = 64 * 2 ** 20          # conservative fallback (v7x per-core)
    vmem_budget = vmem_cap * 3 // 4      # headroom for Mosaic internals

    n_in_bufs = max(2, int(input_buffers))

    def tile_bytes(bb_, tm_):
        return (n_in_bufs * bb_ * C * tm_ * in_bytes          # x tiles
                + 2 * bb_ * tm_ * E * out_bytes               # out tiles
                + 2 * (C * E * in_bytes + E * bias_bytes))    # weight+bias (2x)

    # ---- token tile: whole image per step if it fits, else multiple of 128.
    if HW <= tm:
        tm = HW
    else:
        tm = max(128, (tm // 128) * 128)
    while tm > 128 and tile_bytes(1, tm) > vmem_budget:
        tm = max(128, ((tm // 2) // 128) * 128)
    n_tok_tiles = pl.cdiv(HW, tm)

    # ---- batch tile: amortize ~0.35us/grid-step when the token tile is tiny,
    # but keep >= 2 grid steps when B > 1 so both v7x TensorCores get work.
    if n_tok_tiles == 1:
        bb = min(B, max(1, tokens_per_step // max(tm, 1)), 8)
        if B > 1:
            bb = min(bb, pl.cdiv(B, 2))
    else:
        bb = 1
    while bb > 1 and tile_bytes(bb, tm) > vmem_budget:
        bb = max(1, bb // 2)
    n_batch_tiles = pl.cdiv(B, bb)

    # ---- VMEM limit: never below the real per-step requirement. -----------
    needed = tile_bytes(bb, tm)
    vmem_limit = int(min(max(needed * 3 // 2, 32 * 2 ** 20), vmem_budget))
    if vmem_limit < needed:
        vmem_limit = int(min(needed * 5 // 4, vmem_cap))

    cost = pl.CostEstimate(
        flops=int(2 * B * HW * C * E),
        transcendentals=0,
        bytes_accessed=int(B * C * HW * in_bytes + C * E * in_bytes
                           + E * bias_bytes + B * HW * E * out_bytes),
    )

    # ---- specs -------------------------------------------------------------
    x_spec_kwargs = {}
    if n_in_bufs > 2:                    # deeper input pipelining (v7x knob)
        x_spec_kwargs["pipeline_mode"] = pl.Buffered(n_in_bufs)
    x_spec = pl.BlockSpec((bb, C, tm), lambda b, j: (b, 0, j), **x_spec_kwargs)
    w_spec = pl.BlockSpec((C, E), lambda b, j: (0, 0))          # resident
    if embed_on_lanes:
        b_spec = pl.BlockSpec((1, E), lambda b, j: (0, 0))
        out_shape = jax.ShapeDtypeStruct((B, HW, E), out_dtype)
        o_spec = pl.BlockSpec((bb, tm, E), lambda b, j: (b, j, 0))
    else:
        b_spec = pl.BlockSpec((E, 1), lambda b, j: (0, 0))
        out_shape = jax.ShapeDtypeStruct((B, E, HW), out_dtype)
        o_spec = pl.BlockSpec((bb, E, tm), lambda b, j: (b, 0, j))

    out = pl.pallas_call(
        _make_patch_embed_kernel(bb, embed_on_lanes),
        out_shape=out_shape,
        grid_spec=pltpu.PrefetchScalarGridSpec(
            num_scalar_prefetch=0,
            grid=(n_batch_tiles, n_tok_tiles),
            in_specs=[x_spec, w_spec, b_spec],
            out_specs=o_spec,
        ),
        compiler_params=pltpu.CompilerParams(
            dimension_semantics=("parallel", "parallel"),
            vmem_limit_bytes=vmem_limit,
        ),
        cost_estimate=cost,
    )(x_bct, w_ce, b_arr)

    if not embed_on_lanes:
        # (B, E, HW) -> (B, HW, E); cheap XLA transpose over the small-E output.
        out = jnp.swapaxes(out, 1, 2)
    return out


def _reference(x_nchw, weight, bias):
    B, C, H, W = x_nchw.shape
    t = x_nchw.reshape(B, C, H * W).transpose(0, 2, 1)   # (B, HW, C)
    return jnp.einsum("bnc,ec->bne", t, weight) + bias


if __name__ == "__main__":
    key = jax.random.PRNGKey(0)
    k_x, k_w1, k_b1, k_w2, k_b2 = jax.random.split(key, 5)

    B, C, H, W = 2, 4, 16, 16
    x = jax.random.normal(k_x, (B, C, H, W), dtype=jnp.float32)

    def linear_init(kw, kb, e, c):
        bound = 1.0 / jnp.sqrt(jnp.float32(c))
        w = jax.random.uniform(kw, (e, c), jnp.float32, -bound, bound)
        b = jax.random.uniform(kb, (e,), jnp.float32, -bound, bound)
        return w, b

    # --- small-E path (E < 128 -> lane-dense (B, E, HW) store + XLA swapaxes)
    E1 = 32
    w1, b1 = linear_init(k_w1, k_b1, E1, C)
    y_ref1 = _reference(x, w1, b1)

    y_bf16 = jax.block_until_ready(patch_embedding(x, w1, b1))  # default bf16 compute
    assert y_bf16.shape == (B, H * W, E1)
    assert jnp.allclose(y_bf16, y_ref1, atol=6e-2, rtol=6e-2), float(
        jnp.max(jnp.abs(y_bf16 - y_ref1)))

    y_f32 = jax.block_until_ready(
        patch_embedding(x, w1, b1, compute_dtype=jnp.float32))
    assert jnp.allclose(y_f32, y_ref1, atol=1e-5, rtol=1e-5), float(
        jnp.max(jnp.abs(y_f32 - y_ref1)))

    y_obf = jax.block_until_ready(
        patch_embedding(x, w1, b1, out_dtype=jnp.bfloat16))     # bf16 writeback knob
    assert y_obf.dtype == jnp.bfloat16
    assert jnp.allclose(y_obf.astype(jnp.float32), y_ref1, atol=1e-1, rtol=1e-1)

    # --- large-E path (E >= 128 -> direct lane-dense (B, HW, E) store)
    E2 = 128
    w2, b2 = linear_init(k_w2, k_b2, E2, C)
    y_ref2 = _reference(x, w2, b2)
    y2 = jax.block_until_ready(
        patch_embedding(x, w2, b2, compute_dtype=jnp.float32))
    assert y2.shape == (B, H * W, E2)
    assert jnp.allclose(y2, y_ref2, atol=1e-5, rtol=1e-5), float(
        jnp.max(jnp.abs(y2 - y_ref2)))

    print("KERNEL_OK")
</pallas_src>

<mosaic_0001>
module attributes {stable_mosaic.version = 11 : i64} {
  func.func @kernel(%arg0: i32, %arg1: i32, %arg2: memref<1x4x256xbf16, #tpu.memory_space<vmem>>, %arg3: memref<4x32xbf16, #tpu.memory_space<vmem>>, %arg4: memref<32x1xf32, #tpu.memory_space<vmem>>, %arg5: memref<1x32x256xf32, #tpu.memory_space<vmem>>) attributes {dimension_semantics = [#tpu.dimension_semantics<parallel>, #tpu.dimension_semantics<parallel>], iteration_bounds = array<i64: 2, 1>, scalar_prefetch = 0 : i64, scratch_operands = 0 : i64, tpu.core_type = #tpu.core_type<tc>, window_params = [{transform_indices = @transform_0, window_bounds = array<i64: 1, 4, 256>}, {pipeline_mode = #tpu.pipeline_mode<synchronous>, transform_indices = @transform_1, window_bounds = array<i64: 4, 32>}, {pipeline_mode = #tpu.pipeline_mode<synchronous>, transform_indices = @transform_2, window_bounds = array<i64: 32, 1>}, {transform_indices = @transform_3, window_bounds = array<i64: 1, 32, 256>}]} {
    %c0 = arith.constant 0 : index
    %c0_0 = arith.constant 0 : index
    %0 = vector.load %arg3[%c0, %c0_0] : memref<4x32xbf16, #tpu.memory_space<vmem>>, vector<4x32xbf16>
    %c0_1 = arith.constant 0 : index
    %c0_2 = arith.constant 0 : index
    %1 = vector.load %arg4[%c0_1, %c0_2] : memref<32x1xf32, #tpu.memory_space<vmem>>, vector<32x1xf32>
    %c0_3 = arith.constant 0 : index
    %c0_4 = arith.constant 0 : index
    %c0_5 = arith.constant 0 : index
    %2 = vector.load %arg2[%c0_3, %c0_4, %c0_5] : memref<1x4x256xbf16, #tpu.memory_space<vmem>>, vector<1x4x256xbf16>
    %3 = vector.shape_cast %2 : vector<1x4x256xbf16> to vector<4x256xbf16>
    %cst = arith.constant dense<0.000000e+00> : vector<32x256xf32>
    %4 = tpu.matmul %0, %3, %cst {dimension_numbers = #tpu.dot_dimension_numbers<[0], [0], [1], [1], [0, 1, 1, 1], [], []>} : vector<4x32xbf16>, vector<4x256xbf16>, vector<32x256xf32> -> vector<32x256xf32>
    %5 = vector.broadcast %1 : vector<32x1xf32> to vector<32x256xf32>
    %6 = arith.addf %4, %5 : vector<32x256xf32>
    %c0_6 = arith.constant 0 : index
    %c0_7 = arith.constant 0 : index
    %c0_8 = arith.constant 0 : index
    %7 = vector.load %arg5[%c0_6, %c0_7, %c0_8] : memref<1x32x256xf32, #tpu.memory_space<vmem>>, vector<1x32x256xf32>
    %8 = vector.shape_cast %7 : vector<1x32x256xf32> to vector<32x256xf32>
    %9 = vector.shape_cast %6 : vector<32x256xf32> to vector<1x32x256xf32>
    tpu.vector_store %arg5[%c0_6, %c0_7, %c0_8], %9 {strides = array<i32>} : memref<1x32x256xf32, #tpu.memory_space<vmem>>, vector<1x32x256xf32>,
    return
  }
  func.func @transform_0(%arg0: i32, %arg1: i32) -> (i32, i32, i32) {
    %c0_i32 = arith.constant 0 : i32
    %c0_i32_0 = arith.constant 0 : i32
    return %arg0, %c0_i32, %arg1 : i32, i32, i32
  }
  func.func @transform_1(%arg0: i32, %arg1: i32) -> (i32, i32) {
    %c0_i32 = arith.constant 0 : i32
    %c0_i32_0 = arith.constant 0 : i32
    %c0_i32_1 = arith.constant 0 : i32
    return %c0_i32, %c0_i32_0 : i32, i32
  }
  func.func @transform_2(%arg0: i32, %arg1: i32) -> (i32, i32) {
    %c0_i32 = arith.constant 0 : i32
    %c0_i32_0 = arith.constant 0 : i32
    %c0_i32_1 = arith.constant 0 : i32
    return %c0_i32, %c0_i32_0 : i32, i32
  }
  func.func @transform_3(%arg0: i32, %arg1: i32) -> (i32, i32, i32) {
    %c0_i32 = arith.constant 0 : i32
    %c0_i32_0 = arith.constant 0 : i32
    return %arg0, %c0_i32, %arg1 : i32, i32, i32
  }
}

</mosaic_0001>

<bundles_post_ra>
// kernel: tpu_custom_call.1
= control target key start
LH: loop header
LB: loop body
LE: loop exit
PB: predicated region body
PF: predicated region fallthrough
CT: control target
= control target key end

     0   :  { %8 = vsyncpa [#allocation3], 0  ;;  %s741_s0 = inlined_call_operand.vmem [shape: bf16[2,4,256], index: 0, kind: input, shape index: {}]   ;;  %s742_s1 = inlined_call_operand.vmem [shape: bf16[4,32], index: 1, kind: input, shape index: {}]   ;;  %s743_s2 = inlined_call_operand.vmem [shape: f32[32,1], index: 2, kind: input, shape index: {}]   ;;  %s744_s3 = inlined_call_operand.hbm [shape: f32[2,32,256], index: 3, kind: output, shape index: {}]  }
   0x1   :  { %10 = vsyncpa [#allocation3 + $0x1], 0  ;;  %s607_s12 = smov 0   ;;  %s609_s13 = smov 0  }
   0x2   :  { %s611_s14 = smov 0   ;;  %s613_s15 = smov 0  }
   0x3   :  { %s615_s16 = smov 0   ;;  %s617_s17 = smov 0  }
   0x4 LB: > { %s422_s18 = sadd.s32 4294967295, %s581_s17   ;;  %s423_s19 = sadd.s32 4294967294, %s581_s17   ;;  %s581_s17 = sphi %s617_s17, %s16_s17   ;;  %s577_s16 = sphi %s615_s16, %s751_s16   ;;  %s573_s15 = sphi %s613_s15, %s750_s15   ;;  %s569_s14 = sphi %s611_s14, %s749_s14   ;;  %s565_s13 = sphi %s609_s13, %s748_s13   ;;  %s561_s12 = sphi %s607_s12, %s747_s12  }
   0x5   : > { %s28_s20 = sadd.s32 1, %s577_s16  ;;  %s107_s21 = sadd.s32 1, %s569_s14 }
   0x6   : > { %p30_p0 = scmp.ge.s32.totalorder %s28_s20, 2  ;;  %p117_p1 = scmp.ne.s32.totalorder %s569_s14, %s565_s13 }
   0x7   : > { %p118_p2 = scmp.eq.s32.totalorder %s422_s18, 1  ;;  %p123_p3 = scmp.ne.s32.totalorder %s565_s13, %s561_s12 }
   0x8   : > { %s753_s20 = smov (%p30_p0, %s28_s20), 0  ;;  %p124_p5 = scmp.eq.s32.totalorder %s423_s19, 1 }
   0x9   : > { %p647_p4 = por %p118_p2, %p117_p1  ;;  %s102_s23 = ssub.s32 %s577_s16, %s753_s20 }
   0xa   : > { %p426_p6 = scmp.ge.s32.totalorder %s581_s17, 1  ;;  %p105_p7 = scmp.eq.s32.totalorder %s102_s23, 0 }
   0xb   : > { %p654_p8 = por %p124_p5, %p123_p3  ;;  %p161_p9 = scmp.lt.s32.totalorder %s581_s17, 3 }
   0xc   : > { %s660_s25 = scalar_select %p105_p7, %s569_s14, %s107_s21  }
   0xd   : > { %p162_p10 = pnand %p426_p6, %p161_p9 }
   0xe   : > { %v201_v0 = vld [vmem:[%s742_s1] sm:$0x3] (!%p162_p10)  ;;  %p190_p11 = scmp.lt.s32.totalorder (!%p162_p10), %s573_s15, 1  ;;  %v583_v1 = vmov (!%p162_p10), 0   ;;  %v203_v2 = vld [vmem:[%s743_s2 + $0x8] sm:$0xff] (!%p162_p10)  ;;  %vm259_vm0 = vcmask (!%p162_p10), 1041408  }
   0xf   : > { %165 = sbr.rel (%p162_p10) target bundleno = 354 (0x162), region = 32  ;;  %227 = vxpose.xlu0.c.b16.start.end [1/1] (short) (narrow) (!%p162_p10), %v201_v0, 32  ;;  %298 = vmatprep.mubr.bf16.mxu0 (!%p162_p10), %v583_v1  ;;  %v204_v3 = vld [vmem:[%s743_s2 + $0x10] sm:$0xff] (!%p162_p10)  ;;  %v205_v7 = vld [vmem:[%s743_s2 + $0x18] sm:$0xff] (!%p162_p10)  ;;  %v202_v8 = vld [vmem:[%s743_s2] sm:$0xff] (!%p162_p10)  ;;  %vm252_vm1 = vcmask (!%p162_p10), 31744  }
  0x10   : > { %308 = vmatprep.mubr.bf16.mxu1 (!%p162_p10), %v583_v1  ;;  %502 = vset.pattern.permute.xlu1 (!%p162_p10), %v583_v1  ;;  %s186_s21 = sand.u32 (!%p162_p10), 1, %s565_s13   ;;  %s440_s27 = sshll.u32 (!%p162_p10), %s573_s15, 10 }
  0x11   : > { %214 = vperm.xlu1 (!%p162_p10), %502, %v203_v2   ;;  %s427_s23 = sshll.u32 (!%p162_p10), %s186_s21, 6  ;;  %s584_s6 = smov (!%p162_p10), [#allocation2]  }
  0x12   : > { %s188_s26 = scalar_lea.vmem (!%p162_p10), [#allocation2], %s427_s23  ;;  %s507_s7 = sshll.u32 (!%p162_p10), %s584_s6, 4  ;;  %s508_s7 = int_to_ptr.vmem [resolvable:$false] %s507_s7 }
  0x13   : > { %s343_s28 = sshll.u32 (!%p162_p10), %s188_s26, 4  ;;  %s509_s8 = scalar_lea.vmem (!%p162_p10), %s508_s7, 2048  ;;  %s691_s28 = int_to_ptr.vmem [resolvable:$true] %s343_s28 }
  0x14   : > { %s503_s5 = scalar_lea.vmem (!%p162_p10), %s691_s28, 1024  ;;  %p510_p1 = scmp.lt.s32.totalorder (!%p162_p10), %s691_s28, %s508_s7 }
  0x15   : > { %219 = vperm.xlu1 (!%p162_p10), %502, %v204_v3   ;;  %p504_p12 = scmp.ne.s32.totalorder (!%p162_p10), %s691_s28, %s503_s5  ;;  %p511_p2 = scmp.lt.s32.totalorder (!%p162_p10), %s509_s8, %s503_s5 }
  0x16   : > { %s191_s30 = scalar_select %p190_p11, %s573_s15, 1 }
  0x17   : > { %s695_s15 = scalar_lea.sflag [#allocation3], %s186_s21  ;;  %p505_p13 = pnand %p504_p12, %p647_p4 }
  0x18   : > { %s439_s4 = sshll.u32 %s191_s30, 2  ;;  %501 = vset.pattern.permute.xlu0 %v583_v1  ;;  %p512_p3 = por %p511_p2, %p510_p1 }
  0x19   : > { %s197_s9 = scalar_lea.vmem %s741_s0, %s439_s4  ;;  %224 = vperm.xlu1 %502, %v205_v7   ;;  %s689_s4 = scalar_lea.hbm %s744_s3, %s440_s27 }
  0x1a   : > { %v430_v4 = vld.sshfl [vmem:[%s197_s9] sm:$0x33 pattern:$0x76325410]  ;;  %p506_p0 = pneg %p505_p13 }
  0x1b   : > { %v251_v5 = vcombine.high %v430_v4, %v430_v4  ;;  %v261_v6 = vsel %vm259_vm0, %v430_v4, 0 }
  0x1c   : > { %209 = vperm.xlu0 %501, %v202_v8   ;;  %p513_p5 = pnand %p512_p3, %p506_p0 }
  0x1d   : > { %431 = vmatprep.subr.msk.bf16.mxu0 %vm259_vm0, %v251_v5  ;;  %441 = vmatprep.subr.msk.bf16.mxu1 %vm259_vm0, %v251_v5 }
  0x1e   : > { %267 = vmatpush1.bf16.msra.mxu0 %v261_v6  ;;  %442 = vmatpush1.bf16.msra.mxu1 %v261_v6 }
  0x75   : > { %v235_v9 = vpop.trf.xlu0 }
  0x76   : > { %432 = vmatmul.mubr.msk.bf16.vlgmr.msra.gmra.mrb[0].mxu0 %vm252_vm1, %v235_v9 }
  0x79   : > { %v236_v10 = vpop.trf.xlu0 }
  0x7a   : > { %433 = vmatmul.mubr.msk.bf16.vlgmr.msra.gmra.mrb[0].mxu1 %vm252_vm1, %v236_v10 }
  0x90   : > { %v215_v11 = vpop.permute.xlu1 %214 }
  0x94   : > { %v220_v13 = vpop.permute.xlu1 %219 }
  0x98   : > { %v225_v25 = vpop.permute.xlu1 %224 }
  0x9b   : > { %v210_v12 = vpop.permute.xlu0 %209 }
 0x149   : > { %v300_v14 = vpop.f32.mrb[0].mxu0 }
 0x14a   : > { %v301_v15 = vadd.f32 %v300_v14, %v210_v12  ;;  %v302_v16 = vpop.f32.mrb[1].mxu0 }
 0x14b   : > { %v303_v17 = vadd.f32 %v302_v16, %v210_v12  ;;  %v304_v18 = vpop.f32.mrb[2].mxu0 }
 0x14c   : > { %319 = vst [vmem:[%s188_s26] sm:$0xff] %v301_v15  ;;  %v305_v19 = vadd.f32 %v304_v18, %v215_v11  ;;  %v306_v20 = vpop.f32.mrb[3].mxu0 }
 0x14d   : > { %320 = vst [vmem:[%s188_s26 + $0x8] sm:$0xff] %v303_v17  ;;  %v307_v21 = vadd.f32 %v306_v20, %v215_v11  ;;  %v310_v22 = vpop.f32.mrb[0].mxu1 }
 0x14e   : > { %321 = vst [vmem:[%s188_s26 + $0x10] sm:$0xff] %v305_v19  ;;  %v311_v23 = vadd.f32 %v310_v22, %v220_v13  ;;  %v312_v24 = vpop.f32.mrb[1].mxu1 }
 0x14f   : > { %322 = vst [vmem:[%s188_s26 + $0x18] sm:$0xff] %v307_v21  ;;  %v313_v26 = vadd.f32 %v312_v24, %v220_v13  ;;  %v314_v27 = vpop.f32.mrb[2].mxu1 }
 0x150   : > { %323 = vst [vmem:[%s188_s26 + $0x20] sm:$0xff] %v311_v23  ;;  %v315_v28 = vadd.f32 %v314_v27, %v225_v25  ;;  %v316_v29 = vpop.f32.mrb[3].mxu1 }
 0x151   : > { %324 = vst [vmem:[%s188_s26 + $0x28] sm:$0xff] %v313_v26  ;;  %v317_v30 = vadd.f32 %v316_v29, %v225_v25 }
 0x152   : > { %325 = vst [vmem:[%s188_s26 + $0x30] sm:$0xff] %v315_v28 }
 0x153   : > { %326 = vst [vmem:[%s188_s26 + $0x38] sm:$0xff] %v317_v30 }
 0x154   : > { %516 = shalt.err (!%p513_p5)
}
 0x155   : > { %s517_s9 = scalar_lea.hbm %s689_s4, 1024  ;;  %s521_s18 = scalar_lea.hbm %s744_s3, 2048 }
 0x156   : > { %p518_p6 = scmp.ne.s32.totalorder %s689_s4, %s517_s9  ;;  %p522_p10 = scmp.lt.u32.totalorder %s689_s4, %s744_s3 }
 0x157   : > { %p523_p11 = scmp.lt.u32.totalorder %s521_s18, %s517_s9  ;;  %p525_p13 = scmp.lt.u32.totalorder %s517_s9, %s689_s4 }
 0x158   : > { %p519_p7 = pnand %p518_p6, %p647_p4 }
 0x159   : > { %p524_p12 = por %p523_p11, %p522_p10 }
 0x15a   : > { %p520_p9 = pneg %p519_p7 }
 0x15b   : > { %p526_p0 = por %p525_p13, %p524_p12 }
 0x15d   : > { %p527_p1 = pnand %p526_p0, %p520_p9 }
 0x15f   : > { %530 = shalt.err (!%p527_p1)
}
 0x160   : > { %s585_s23 = smov 256   ;;  %s586_s26 = smov 16  }
 0x161   : > { %443 = dma.vmem_to_hbm [thread:$0]  (%p647_p4), %s691_s28, 1024, %s689_s4, %s695_s15, %s585_s23, %s585_s23, %s586_s26  }
 0x162 PF: > { %p449_p2 = scmp.ge.s32.totalorder %s581_s17, 2  ;;  %s358_s27 = sand.u32 1, %s561_s12  }
 0x163   : > { %s359_s29 = scalar_lea.sflag [#allocation3], %s358_s27 }
 0x164   : > { %p446_p3 = pnand %p449_p2, %p654_p8 }
 0x166   : > { %556 = dma.done.wait (!%p446_p3), %s359_s29, 1024  }
 0x167   : > { %558 = vsyncadd (!%p446_p3), %s359_s29, 4294966272  ;;  %s16_s17 = sadd.s32 1, %s581_s17   ;;  %s747_s12 = smov %s565_s13 }
 0x168   : > { %p13_p5 = scmp.ge.s32.totalorder %s16_s17, 4   ;;  %s748_s13 = smov %s569_s14 }
 0x169   : > { %s749_s14 = smov %s660_s25  ;;  %s750_s15 = smov %s577_s16 }
 0x16a   : > { %s751_s16 = smov %s753_s20  ;;  %15 = sbr.rel (!%p13_p5) target bundleno = 4 (0x4), region = 67 }
 0x171   :  { %364 = vsyncpa [#allocation3], 1 }
 0x172   :  { %366 = vsyncpa [#allocation3 + $0x1], 1 }

</bundles_post_ra>
